<compile_context>
chip_gen: v7x
topology: tpu7x:2x2x1
jax: 0.10.0
libtpu: 0.0.40
codegen_flags: <defaults>
</compile_context>

<pallas_src>
import numpy as np
import jax
import jax.numpy as jnp
from jax.experimental import pallas as pl
from jax.experimental.pallas import tpu as pltpu


def _round_up(x, m):
    return ((x + m - 1) // m) * m


def _vmem_budget_bytes():
    """Half the physical VMEM of the current generation (32 MiB conservative fallback)."""
    cap = None
    try:
        cap = getattr(pltpu.get_tpu_info(), "vmem_capacity_bytes", None)
    except Exception:
        cap = None
    if not cap:
        cap = 64 * 1024 * 1024          # v7x has the smallest VMEM (64 MiB per TC)
    return int(cap) // 2                # leave headroom for compiler scratch


_MIN_SPLIT_BATCH = 128  # below this, per-step overhead outweighs a megacore split


def _pick_batch_tile(B, D, Kp, itemsize, vmem_budget):
    """Largest batch tile (multiple of 8) whose double-buffered footprint fits VMEM.

    Footprint = c + delta tiles (2 pipeline buffers each) + out tile (2 buffers)
    + resident selection matrices W, S (also double-buffered by the pipeline).
    """
    per_row = (2 * 2 * D + 2 * Kp) * itemsize          # per batch row, in bytes
    fixed = 2 * 2 * D * Kp * itemsize                  # W and S
    avail = vmem_budget - fixed
    if avail <= per_row * 8:
        # TODO(synk): for extremely large D, add a D-reduction grid axis ("arbitrary")
        # with an f32 accumulator instead of shrinking TB to the floor.
        max_tb = 8
    else:
        max_tb = max(8, min(1024, (avail // per_row) // 8 * 8))
    if B <= 8 or (B <= max_tb and B < _MIN_SPLIT_BATCH):
        return B                                        # single block (full-dim exemption)
    # >=2 tiles so v7x's two TensorCores both stream HBM; respect the VMEM ceiling.
    return max(8, min(max_tb, _round_up(pl.cdiv(B, 2), 8)))


def _trajectory_kernel(c_ref, d_ref, w_ref, s_ref, out_ref):
    """out = c @ W + delta @ S  ->  lane-dense [left | right | 0-pad] slab.

    c_ref, d_ref: (TB, D)  box centers / radii (batch tile)
    w_ref:        (D, Kp)  [onehot | onehot | 0]
    s_ref:        (D, Kp)  [-onehot | +onehot | 0]
    out_ref:      (TB, Kp) out[:, :K] = left = c@onehot - d@onehot
                           out[:, K:2K] = right = c@onehot + d@onehot
    Two MXU dots, no in-kernel iota/compare, no lane concatenate.
    """
    out_ref[...] = (
        jnp.dot(c_ref[...], w_ref[...], preferred_element_type=jnp.float32)
        + jnp.dot(d_ref[...], s_ref[...], preferred_element_type=jnp.float32)
    ).astype(out_ref.dtype)


def _selection_matrices(idx_np, D, K, Kp, dtype):
    idx = jnp.asarray(idx_np, jnp.int32).reshape(K)
    onehot = (jnp.arange(D, dtype=jnp.int32)[:, None] == idx[None, :]).astype(dtype)  # (D, K)
    zeros = jnp.zeros((D, Kp), dtype)
    w = zeros.at[:, :K].set(onehot).at[:, K:2 * K].set(onehot)
    s = zeros.at[:, :K].set(-onehot).at[:, K:2 * K].set(onehot)
    return w, s


def trajectory_interval(c, delta, target_idx):
    """Returns (left, right), each (B, K) = gather(c ∓ delta, target_idx, axis=1)."""
    B, D = c.shape
    idx_np = np.asarray(target_idx).reshape(-1).astype(np.int32)
    K = int(idx_np.shape[0])
    if (idx_np < 0).any() or (idx_np >= D).any():
        # torch.index_select raises on out-of-range; the one-hot gather would
        # silently produce zero columns, so guard here with a real error.
        raise ValueError("target_idx out of range")

    dtype = c.dtype
    itemsize = jnp.dtype(dtype).itemsize
    Kp = max(128, _round_up(2 * K, 128))            # lane-dense (unmasked) stores

    budget = _vmem_budget_bytes()
    TB = _pick_batch_tile(B, D, Kp, itemsize, budget)
    nb = pl.cdiv(B, TB)
    Bp = nb * TB
    if Bp != B:                                     # ragged batch -> zero-pad, slice later
        pad = ((0, Bp - B), (0, 0))
        c = jnp.pad(c, pad)
        delta = jnp.pad(delta, pad)

    w, s = _selection_matrices(idx_np, D, K, Kp, dtype)

    grid_spec = pltpu.PrefetchScalarGridSpec(
        num_scalar_prefetch=0,
        grid=(nb,),
        in_specs=[
            pl.BlockSpec((TB, D), lambda i: (i, 0)),   # c      (batch-tiled)
            pl.BlockSpec((TB, D), lambda i: (i, 0)),   # delta  (batch-tiled)
            pl.BlockSpec((D, Kp), lambda i: (0, 0)),   # W      (resident, constant block)
            pl.BlockSpec((D, Kp), lambda i: (0, 0)),   # S      (resident, constant block)
        ],
        out_specs=pl.BlockSpec((TB, Kp), lambda i: (i, 0)),
    )
    out = pl.pallas_call(
        _trajectory_kernel,
        out_shape=jax.ShapeDtypeStruct((Bp, Kp), dtype),
        grid_spec=grid_spec,
        compiler_params=pltpu.CompilerParams(
            dimension_semantics=("parallel",),          # batch tiles are independent
            vmem_limit_bytes=budget,                    # covers v5e's 16 MiB default
        ),
    )(c, delta, w, s)

    left = out[:B, :K]
    right = out[:B, K:2 * K]
    return left, right


class Box:
    """Minimal stand-in for the abstract-domain value used by gpu_DSE."""

    def __init__(self, c, delta):
        self.c = c          # (B, D) centers
        self.delta = delta  # (B, D) radii


class Trajectory:
    """JAX/Pallas port of gpu_DSE.modules.Trajectory.forward."""

    def __init__(self, target_idx):
        self.target_idx = np.asarray(target_idx, dtype=np.int32)

    def forward(self, states):
        x = states['x']
        trajectories_l = states['trajectories_l']
        trajectories_r = states['trajectories_r']
        B, D = x.c.shape

        # Hot path: column gather + interval bounds in one Pallas call.
        left, right = trajectory_interval(x.c, x.delta, self.target_idx)

        # Host-side trajectory bookkeeping (kept for semantic parity with the
        # PyTorch module: per-sample rows appended to Python lists).
        # TODO(synk): for long rollouts, accumulate into a preallocated (T, B, K)
        # device buffer (lax.dynamic_update_slice / input_output_aliases) instead
        # of per-row Python appends — that is the dominant wall-clock cost.
        for x_idx in range(B):
            trajectories_l[x_idx].append(left[x_idx])
            trajectories_r[x_idx].append(right[x_idx])
        states['trajectories_l'] = trajectories_l
        states['trajectories_r'] = trajectories_r
        return states

    __call__ = forward


if __name__ == "__main__":
    # Small deterministic example: B=4 samples, D=16 state features, K=2 tracked vars.
    B, D = 4, 16
    target_idx = [1, 5]

    key = jax.random.PRNGKey(0)
    kc, kd = jax.random.split(key)
    c = jax.random.normal(kc, (B, D), dtype=jnp.float32)
    delta = jnp.abs(jax.random.normal(kd, (B, D), dtype=jnp.float32))

    states = {
        'x': Box(c, delta),
        'trajectories_l': [[] for _ in range(B)],
        'trajectories_r': [[] for _ in range(B)],
    }

    traj = Trajectory(target_idx)
    states = traj(states)

    # Block on results.
    for x_idx in range(B):
        jax.block_until_ready(states['trajectories_l'][x_idx][-1])
        jax.block_until_ready(states['trajectories_r'][x_idx][-1])

    # Cross-check against a pure-JAX reference of the same semantics.
    idx = jnp.asarray(target_idx, dtype=jnp.int32)
    ref_left = jnp.take(c, idx, axis=1) - jnp.take(delta, idx, axis=1)
    ref_right = jnp.take(c, idx, axis=1) + jnp.take(delta, idx, axis=1)
    got_left = jnp.stack([states['trajectories_l'][i][-1] for i in range(B)])
    got_right = jnp.stack([states['trajectories_r'][i][-1] for i in range(B)])
    assert jnp.allclose(got_left, ref_left, atol=1e-6)
    assert jnp.allclose(got_right, ref_right, atol=1e-6)

    print("KERNEL_OK")
</pallas_src>

<mosaic_0001>
module attributes {stable_mosaic.version = 11 : i64} {
  func.func @_trajectory_kernel(%arg0: i32, %arg1: memref<4x16xf32, #tpu.memory_space<vmem>>, %arg2: memref<4x16xf32, #tpu.memory_space<vmem>>, %arg3: memref<16x128xf32, #tpu.memory_space<vmem>>, %arg4: memref<16x128xf32, #tpu.memory_space<vmem>>, %arg5: memref<4x128xf32, #tpu.memory_space<vmem>>) attributes {dimension_semantics = [#tpu.dimension_semantics<parallel>], iteration_bounds = array<i64: 1>, scalar_prefetch = 0 : i64, scratch_operands = 0 : i64, tpu.core_type = #tpu.core_type<tc>, window_params = [{transform_indices = @transform_0, window_bounds = array<i64: 4, 16>}, {transform_indices = @transform_1, window_bounds = array<i64: 4, 16>}, {pipeline_mode = #tpu.pipeline_mode<synchronous>, transform_indices = @transform_2, window_bounds = array<i64: 16, 128>}, {pipeline_mode = #tpu.pipeline_mode<synchronous>, transform_indices = @transform_3, window_bounds = array<i64: 16, 128>}, {transform_indices = @transform_4, window_bounds = array<i64: 4, 128>}]} {
    %c0 = arith.constant 0 : index
    %c0_0 = arith.constant 0 : index
    %0 = vector.load %arg1[%c0, %c0_0] : memref<4x16xf32, #tpu.memory_space<vmem>>, vector<4x16xf32>
    %c0_1 = arith.constant 0 : index
    %c0_2 = arith.constant 0 : index
    %1 = vector.load %arg3[%c0_1, %c0_2] : memref<16x128xf32, #tpu.memory_space<vmem>>, vector<16x128xf32>
    %cst = arith.constant dense<0.000000e+00> : vector<4x128xf32>
    %2 = tpu.matmul %0, %1, %cst {dimension_numbers = #tpu.dot_dimension_numbers<[1], [0], [0], [1], [0, 0, 1, 1], [], []>} : vector<4x16xf32>, vector<16x128xf32>, vector<4x128xf32> -> vector<4x128xf32>
    %c0_3 = arith.constant 0 : index
    %c0_4 = arith.constant 0 : index
    %3 = vector.load %arg2[%c0_3, %c0_4] : memref<4x16xf32, #tpu.memory_space<vmem>>, vector<4x16xf32>
    %c0_5 = arith.constant 0 : index
    %c0_6 = arith.constant 0 : index
    %4 = vector.load %arg4[%c0_5, %c0_6] : memref<16x128xf32, #tpu.memory_space<vmem>>, vector<16x128xf32>
    %cst_7 = arith.constant dense<0.000000e+00> : vector<4x128xf32>
    %5 = tpu.matmul %3, %4, %cst_7 {dimension_numbers = #tpu.dot_dimension_numbers<[1], [0], [0], [1], [0, 0, 1, 1], [], []>} : vector<4x16xf32>, vector<16x128xf32>, vector<4x128xf32> -> vector<4x128xf32>
    %6 = arith.addf %2, %5 : vector<4x128xf32>
    %c0_8 = arith.constant 0 : index
    %c0_9 = arith.constant 0 : index
    %7 = vector.load %arg5[%c0_8, %c0_9] : memref<4x128xf32, #tpu.memory_space<vmem>>, vector<4x128xf32>
    tpu.vector_store %arg5[%c0_8, %c0_9], %6 {strides = array<i32>} : memref<4x128xf32, #tpu.memory_space<vmem>>, vector<4x128xf32>,
    return
  }
  func.func @transform_0(%arg0: i32) -> (i32, i32) {
    %c0_i32 = arith.constant 0 : i32
    %c0_i32_0 = arith.constant 0 : i32
    return %arg0, %c0_i32 : i32, i32
  }
  func.func @transform_1(%arg0: i32) -> (i32, i32) {
    %c0_i32 = arith.constant 0 : i32
    %c0_i32_0 = arith.constant 0 : i32
    return %arg0, %c0_i32 : i32, i32
  }
  func.func @transform_2(%arg0: i32) -> (i32, i32) {
    %c0_i32 = arith.constant 0 : i32
    %c0_i32_0 = arith.constant 0 : i32
    %c0_i32_1 = arith.constant 0 : i32
    return %c0_i32, %c0_i32_0 : i32, i32
  }
  func.func @transform_3(%arg0: i32) -> (i32, i32) {
    %c0_i32 = arith.constant 0 : i32
    %c0_i32_0 = arith.constant 0 : i32
    %c0_i32_1 = arith.constant 0 : i32
    return %c0_i32, %c0_i32_0 : i32, i32
  }
  func.func @transform_4(%arg0: i32) -> (i32, i32) {
    %c0_i32 = arith.constant 0 : i32
    %c0_i32_0 = arith.constant 0 : i32
    return %arg0, %c0_i32 : i32, i32
  }
}

</mosaic_0001>

<bundles_post_ra>
// kernel: tpu_custom_call.1
= control target key start
LH: loop header
LB: loop body
LE: loop exit
PB: predicated region body
PF: predicated region fallthrough
CT: control target
= control target key end

     0   :  { %9 = vsyncpa [#allocation3], 0  ;;  %s492_s0 = inlined_call_operand.hbm [shape: f32[4,16], index: 0, kind: input, shape index: {}]   ;;  %s493_s1 = inlined_call_operand.hbm [shape: f32[4,16], index: 1, kind: input, shape index: {}]   ;;  %s494_s2 = inlined_call_operand.hbm [shape: f32[16,128], index: 2, kind: input, shape index: {}]   ;;  %s495_s3 = inlined_call_operand.hbm [shape: f32[16,128], index: 3, kind: input, shape index: {}]   ;;  %s496_s4 = inlined_call_operand.hbm [shape: f32[4,128], index: 4, kind: output, shape index: {}]  }
   0x1   :  { %10 = vsyncpa [#allocation6], 0 }
   0x2   :  { %11 = vsyncpa [#allocation9], 0 }
   0x3   :  { %12 = vsyncpa [#allocation4], 0  ;;  %s397_s15 = smov [#allocation5]   ;;  %s398_s17 = smov [#allocation2]  }
   0x4   :  { %s29_s16 = sshll.u32 %s397_s15, 4  ;;  %s19_s18 = sshll.u32 %s398_s17, 4  ;;  %s30_s16 = int_to_ptr.vmem [resolvable:$true] %s29_s16  ;;  %s20_s18 = int_to_ptr.vmem [resolvable:$true] %s19_s18 }
   0x5   :  { %s279_s21 = scalar_lea.hbm %s493_s1, 64 }
   0x6   :  { %p280_p0 = scmp.ne.s32.totalorder %s493_s1, %s279_s21  ;;  %p283_p1 = scmp.lt.u32.totalorder %s279_s21, %s493_s1 }
   0x8   :  { %p285_p2 = pnand %p283_p1, %p280_p0 }
   0xa   :  { %288 = shalt.err (!%p285_p2)
}
   0xb   :  { %s289_s26 = scalar_lea.vmem %s30_s16, 64  ;;  %p294_p4 = scmp.lt.s32.totalorder %s30_s16, %s30_s16 }
   0xc   :  { %p290_p3 = scmp.ne.s32.totalorder %s30_s16, %s289_s26  ;;  %p295_p5 = scmp.lt.s32.totalorder %s289_s26, %s289_s26 }
   0xe   :  { %p296_p6 = por %p295_p5, %p294_p4 }
  0x10   :  { %p297_p7 = pnand %p296_p6, %p290_p3 }
  0x12   :  { %300 = shalt.err (!%p297_p7)
}
  0x13   :  { %32 = dma.hbm_to_vmem [thread:$0]  %s493_s1, 64, %s30_s16, [#allocation6]  }
  0x14   :  { %s301_s5 = scalar_lea.hbm %s492_s0, 64 }
  0x15   :  { %p302_p8 = scmp.ne.s32.totalorder %s492_s0, %s301_s5  ;;  %p305_p9 = scmp.lt.u32.totalorder %s301_s5, %s492_s0 }
  0x17   :  { %p307_p10 = pnand %p305_p9, %p302_p8 }
  0x19   :  { %310 = shalt.err (!%p307_p10)
}
  0x1a   :  { %s311_s10 = scalar_lea.vmem %s20_s18, 64  ;;  %p316_p12 = scmp.lt.s32.totalorder %s20_s18, %s20_s18 }
  0x1b   :  { %p312_p11 = scmp.ne.s32.totalorder %s20_s18, %s311_s10  ;;  %p317_p13 = scmp.lt.s32.totalorder %s311_s10, %s311_s10 }
  0x1d   :  { %p318_p0 = por %p317_p13, %p316_p12 }
  0x1f   :  { %p319_p1 = pnand %p318_p0, %p312_p11 }
  0x21   :  { %322 = shalt.err (!%p319_p1)
}
  0x22   :  { %22 = dma.hbm_to_vmem [thread:$0]  %s492_s0, 64, %s20_s18, [#allocation3]  }
  0x23   :  { %s399_s12 = smov [#allocation7]   ;;  %s323_s16 = scalar_lea.hbm %s494_s2, 256 }
  0x24   :  { %s38_s13 = sshll.u32 %s399_s12, 4  ;;  %p324_p2 = scmp.ne.s32.totalorder %s494_s2, %s323_s16  ;;  %s39_s13 = int_to_ptr.vmem [resolvable:$true] %s38_s13 }
  0x25   :  { %p327_p3 = scmp.lt.u32.totalorder %s323_s16, %s494_s2 }
  0x27   :  { %p329_p4 = pnand %p327_p3, %p324_p2 }
  0x29   :  { %332 = shalt.err (!%p329_p4)
}
  0x2a   :  { %s333_s22 = scalar_lea.vmem %s39_s13, 256  ;;  %p338_p6 = scmp.lt.s32.totalorder %s39_s13, %s39_s13 }
  0x2b   :  { %p334_p5 = scmp.ne.s32.totalorder %s39_s13, %s333_s22  ;;  %p339_p7 = scmp.lt.s32.totalorder %s333_s22, %s333_s22 }
  0x2d   :  { %p340_p8 = por %p339_p7, %p338_p6 }
  0x2f   :  { %p341_p9 = pnand %p340_p8, %p334_p5 }
  0x31   :  { %344 = shalt.err (!%p341_p9)
}
  0x32   :  { %s400_s0 = smov 128   ;;  %s401_s18 = smov 8  }
  0x33   :  { %44 = dma.hbm_to_vmem [thread:$0]  %s494_s2, 256, %s39_s13, [#allocation6], %s400_s0, %s400_s0, %s401_s18  }
  0x34   :  { %s402_s25 = smov [#allocation8]   ;;  %s345_s29 = scalar_lea.hbm %s495_s3, 256 }
  0x35   :  { %s50_s26 = sshll.u32 %s402_s25, 4  ;;  %p346_p10 = scmp.ne.s32.totalorder %s495_s3, %s345_s29  ;;  %s51_s26 = int_to_ptr.vmem [resolvable:$true] %s50_s26 }
  0x36   :  { %p349_p11 = scmp.lt.u32.totalorder %s345_s29, %s495_s3 }
  0x38   :  { %p351_p12 = pnand %p349_p11, %p346_p10 }
  0x3a   :  { %354 = shalt.err (!%p351_p12)
}
  0x3b   :  { %s355_s8 = scalar_lea.vmem %s51_s26, 256  ;;  %p360_p0 = scmp.lt.s32.totalorder %s51_s26, %s51_s26 }
  0x3c   :  { %p356_p13 = scmp.ne.s32.totalorder %s51_s26, %s355_s8  ;;  %p361_p1 = scmp.lt.s32.totalorder %s355_s8, %s355_s8 }
  0x3e   :  { %p362_p2 = por %p361_p1, %p360_p0 }
  0x40   :  { %p363_p3 = pnand %p362_p2, %p356_p13 }
  0x42   :  { %366 = shalt.err (!%p363_p3)
}
  0x43   :  { %56 = dma.hbm_to_vmem [thread:$0]  %s495_s3, 256, %s51_s26, [#allocation9], %s400_s0, %s400_s0, %s401_s18  }
  0x44   :  { %389 = dma.done.wait [#allocation3], 64  }
  0x45   :  { %390 = vsyncadd [#allocation3], 4294967232 }
  0x46   :  { %391 = dma.done.wait [#allocation6], 320  }
  0x47   :  { %392 = vsyncadd [#allocation6], 4294966976 }
  0x48   :  { %393 = dma.done.wait [#allocation9], 256  }
  0x49   :  { %394 = vsyncadd [#allocation9], 4294967040  ;;  %v403_v0 = vmov 0.0|0.0   ;;  %vm404_vm0 = vmmov 0   ;;  %v405_v1 = vmov 0.0   ;;  %v73_v2 = vld [vmem:[#allocation8] sm:$0xff] }
  0x4a   :  { %262 = vmatprep.subr.bf16.mxu1 %v403_v0  ;;  %265 = vmatprep.subr.bf16.mxu0 %v403_v0  ;;  %v74_v3 = vld [vmem:[#allocation8 + $0x8] sm:$0xff]  ;;  %v70_v4 = vld [vmem:[#allocation7] sm:$0xff]  ;;  %v71_v6 = vld [vmem:[#allocation7 + $0x8] sm:$0xff]  ;;  %vm75_vm1 = vcmask 130048   ;;  %s406_s3 = smov [#allocation10]  }
  0x4b   :  { %252 = vmatprep.mubr.msk.f32.mxu1 %vm404_vm0, %v405_v1  ;;  %259 = vmatprep.mubr.msk.f32.mxu0 %vm404_vm0, %v405_v1  ;;  %v263_v5 = vpack.c.bf16 %v74_v3, %v73_v2  ;;  %v266_v7 = vpack.c.bf16 %v71_v6, %v70_v4  ;;  %v72_v8 = vld [vmem:[#allocation5] sm:$0xf]  ;;  %v69_v9 = vld [vmem:[#allocation2] sm:$0xf]  ;;  %s229_s10 = sshll.u32 %s406_s3, 4  ;;  %s230_s10 = int_to_ptr.vmem [resolvable:$true] %s229_s10 }
  0x4c   :  { %s367_s1 = scalar_lea.vmem %s230_s10, 64  ;;  %p372_p5 = scmp.lt.s32.totalorder %s230_s10, %s230_s10 }
  0x4d   :  { %264 = vmatpush3.bf16.msra.mxu1 %v263_v5  ;;  %267 = vmatpush3.bf16.msra.mxu0 %v266_v7  ;;  %p368_p4 = scmp.ne.s32.totalorder %s230_s10, %s367_s1  ;;  %p373_p6 = scmp.lt.s32.totalorder %s367_s1, %s367_s1 }
  0x4f   :  { %p374_p7 = por %p373_p6, %p372_p5 }
  0x50   :  { %253 = vmatmul.mubr.msk.f32.vlgmr.msra.gmra.mrb[0].mxu1 %vm75_vm1, %v72_v8  ;;  %260 = vmatmul.mubr.msk.f32.vlgmr.msra.gmra.mrb[0].mxu0 %vm75_vm1, %v69_v9 }
  0x51   :  { %p375_p8 = pnand %p374_p7, %p368_p4 }
 0x123   :  { %v145_v10 = vpop.f32.mrb[0].mxu1  ;;  %v218_v11 = vpop.f32.mrb[0].mxu0 }
 0x124   :  { %v254_v12 = vpop.f32.mrb[1].mxu1  ;;  %v219_v13 = vadd.f32 %v218_v11, %v145_v10  ;;  %v261_v14 = vpop.f32.mrb[1].mxu0 }
 0x126   :  { %222 = vst [vmem:[#allocation10] sm:$0xf] %v219_v13 }
 0x127   :  { %378 = shalt.err (!%p375_p8)
}
 0x128   :  { %s379_s13 = scalar_lea.hbm %s496_s4, 64 }
 0x129   :  { %p380_p9 = scmp.ne.s32.totalorder %s496_s4, %s379_s13  ;;  %p383_p10 = scmp.lt.u32.totalorder %s379_s13, %s496_s4 }
 0x12b   :  { %p385_p11 = pnand %p383_p10, %p380_p9 }
 0x12d   :  { %388 = shalt.err (!%p385_p11)
}
 0x12e   :  { %232 = dma.vmem_to_hbm [thread:$0]  %s230_s10, 64, %s496_s4, [#allocation4]  }
 0x12f   :  { %395 = dma.done.wait [#allocation4], 64  }
 0x130   :  { %396 = vsyncadd [#allocation4], 4294967232 }
 0x131   :  { %236 = vsyncpa [#allocation3], 1 }
 0x132   :  { %237 = vsyncpa [#allocation6], 1 }
 0x133   :  { %238 = vsyncpa [#allocation9], 1 }
 0x134   :  { %239 = vsyncpa [#allocation4], 1 }

</bundles_post_ra>
